<compile_context>
chip_gen: v5e
topology: v5e:2x2
jax: 0.10.0
libtpu: 0.0.40
codegen_flags: <defaults>
</compile_context>

<pallas_src>
import jax
import jax.numpy as jnp
from jax.experimental import pallas as pl
from jax.experimental.pallas import tpu as pltpu


def _spatial_att1_kernel(b_ref, w_ref, x_ref, o_ref):
    # b_ref: (1,) f32 in SMEM   w_ref: (1, C)   x_ref: (C, tile_hw)
    # o_ref: (1, tile_hw)
    s = jnp.dot(w_ref[...], x_ref[...], preferred_element_type=jnp.float32)
    s = s + b_ref[0]
    o_ref[...] = jax.nn.sigmoid(s).astype(o_ref.dtype)


def spatial_att1_forward(x, w, b, *, max_tile_hw=8192):
    """x: (N, 64, H, W) NCHW (PyTorch convention). Returns (N, 1, H, W).

    x may be f32 or bf16 (accumulation is f32 either way); no wrapper cast is
    performed so a bf16 producer halves HBM read traffic for free.
    """
    N, C, H, W = x.shape
    HW = H * W

    # Free views / tiny param reshapes (no HBM pass over the activation).
    x3d = x.reshape(N, C, HW)                  # trailing-dim merge: free
    w2d = w.reshape(1, C).astype(x.dtype)      # (1, 64, 1, 1) -> (1, 64)
    b1 = b.reshape(1).astype(jnp.float32)      # (1,) scalar, lives in SMEM

    # Tile over the HW axis: either the full extent (any size allowed) or a
    # 128-multiple chunk (max_tile_hw).  Partial tail blocks are masked by
    # Pallas, so no divisibility requirement on H*W.
    tile_hw = HW if HW <= max_tile_hw else max_tile_hw
    grid = (N, pl.cdiv(HW, tile_hw))

    out = pl.pallas_call(
        _spatial_att1_kernel,
        out_shape=jax.ShapeDtypeStruct((N, 1, HW), x.dtype),
        grid_spec=pltpu.PrefetchScalarGridSpec(
            num_scalar_prefetch=0,
            grid=grid,
            in_specs=[
                # bias: single scalar, kept in SMEM (no VMEM tile / broadcast)
                pl.BlockSpec(memory_space=pltpu.MemorySpace.SMEM),
                # weights: tiny, resident across all grid steps
                pl.BlockSpec((1, C), lambda n, j: (0, 0)),
                # activations: one image's column block, no transpose needed
                pl.BlockSpec((None, C, tile_hw), lambda n, j: (n, 0, j)),
            ],
            out_specs=pl.BlockSpec((None, 1, tile_hw), lambda n, j: (n, 0, j)),
        ),
        compiler_params=pltpu.CompilerParams(
            dimension_semantics=("parallel", "parallel")),
    )(b1, w2d, x3d)

    return out.reshape(N, 1, H, W)


def _reference(x, w, b):
    N, C, H, W = x.shape
    return jax.nn.sigmoid(
        jnp.einsum("nchw,oc->nohw", x, w.reshape(1, C))
        + b.reshape(1, 1, 1, 1))


if __name__ == "__main__":
    key = jax.random.PRNGKey(0)
    kx, kw, kb = jax.random.split(key, 3)

    # Module requires 64 input channels (Conv2d(64, 1, kernel_size=1)).
    C = 64
    fan_in = C * 1 * 1
    bound = 1.0 / (fan_in ** 0.5)
    w = jax.random.uniform(kw, (1, C, 1, 1), minval=-bound, maxval=bound,
                           dtype=jnp.float32)
    b = jax.random.uniform(kb, (1,), minval=-bound, maxval=bound,
                           dtype=jnp.float32)

    # 1) Main shape: aligned spatial extent (HW = 256, one 256-wide block).
    N, H, W = 2, 16, 16
    x = jax.random.normal(kx, (N, C, H, W), dtype=jnp.float32)
    out = jax.block_until_ready(spatial_att1_forward(x, w, b))
    ref = _reference(x, w, b)
    assert out.shape == (N, 1, H, W)
    assert jnp.allclose(out, ref, atol=1e-5, rtol=1e-5)

    # 2) Unaligned spatial extent (HW = 25): full-extent block path.
    x_odd = jax.random.normal(kx, (N, C, 5, 5), dtype=jnp.float32)
    out_odd = jax.block_until_ready(spatial_att1_forward(x_odd, w, b))
    assert jnp.allclose(out_odd, _reference(x_odd, w, b), atol=1e-5, rtol=1e-5)

    # 3) Non-divisible tiling (HW = 320, tile 128): masked tail-block path.
    x_tail = jax.random.normal(kx, (N, C, 16, 20), dtype=jnp.float32)
    out_tail = jax.block_until_ready(
        spatial_att1_forward(x_tail, w, b, max_tile_hw=128))
    assert jnp.allclose(out_tail, _reference(x_tail, w, b),
                        atol=1e-5, rtol=1e-5)

    print("KERNEL_OK")
</pallas_src>

<mosaic_0001>
module attributes {stable_mosaic.version = 11 : i64} {
  func.func @_spatial_att1_kernel(%arg0: i32, %arg1: i32, %arg2: memref<1xf32, #tpu.memory_space<smem>>, %arg3: memref<1x64xf32, #tpu.memory_space<vmem>>, %arg4: memref<1x64x256xf32, #tpu.memory_space<vmem>>, %arg5: memref<1x1x256xf32, #tpu.memory_space<vmem>>) attributes {dimension_semantics = [#tpu.dimension_semantics<parallel>, #tpu.dimension_semantics<parallel>], iteration_bounds = array<i64: 2, 1>, scalar_prefetch = 0 : i64, scratch_operands = 0 : i64, tpu.core_type = #tpu.core_type<tc>, window_params = [{transform_indices = @transform_0, window_bounds = array<i64: 1>}, {pipeline_mode = #tpu.pipeline_mode<synchronous>, transform_indices = @transform_1, window_bounds = array<i64: 1, 64>}, {transform_indices = @transform_2, window_bounds = array<i64: 1, 64, 256>}, {transform_indices = @transform_3, window_bounds = array<i64: 1, 1, 256>}]} {
    %c0 = arith.constant 0 : index
    %c0_0 = arith.constant 0 : index
    %0 = vector.load %arg3[%c0, %c0_0] : memref<1x64xf32, #tpu.memory_space<vmem>>, vector<1x64xf32>
    %c0_1 = arith.constant 0 : index
    %c0_2 = arith.constant 0 : index
    %c0_3 = arith.constant 0 : index
    %1 = vector.load %arg4[%c0_1, %c0_2, %c0_3] : memref<1x64x256xf32, #tpu.memory_space<vmem>>, vector<1x64x256xf32>
    %2 = vector.shape_cast %1 : vector<1x64x256xf32> to vector<64x256xf32>
    %cst = arith.constant dense<0.000000e+00> : vector<1x256xf32>
    %3 = tpu.matmul %0, %2, %cst {dimension_numbers = #tpu.dot_dimension_numbers<[1], [0], [0], [1], [0, 0, 1, 1], [], []>} : vector<1x64xf32>, vector<64x256xf32>, vector<1x256xf32> -> vector<1x256xf32>
    %c0_4 = arith.constant 0 : index
    %4 = memref.load %arg2[%c0_4] : memref<1xf32, #tpu.memory_space<smem>>
    %5 = vector.broadcast %4 : f32 to vector<1x256xf32>
    %6 = arith.addf %3, %5 : vector<1x256xf32>
    %7 = arith.negf %6 : vector<1x256xf32>
    %8 = math.exp %7 : vector<1x256xf32>
    %cst_5 = arith.constant 1.000000e+00 : f32
    %9 = vector.broadcast %cst_5 : f32 to vector<1x256xf32>
    %10 = arith.addf %9, %8 : vector<1x256xf32>
    %11 = arith.divf %9, %10 : vector<1x256xf32>
    %c0_6 = arith.constant 0 : index
    %c0_7 = arith.constant 0 : index
    %c0_8 = arith.constant 0 : index
    %12 = vector.load %arg5[%c0_6, %c0_7, %c0_8] : memref<1x1x256xf32, #tpu.memory_space<vmem>>, vector<1x1x256xf32>
    %13 = vector.shape_cast %12 : vector<1x1x256xf32> to vector<1x256xf32>
    %14 = vector.shape_cast %11 : vector<1x256xf32> to vector<1x1x256xf32>
    tpu.vector_store %arg5[%c0_6, %c0_7, %c0_8], %14 {strides = array<i32>} : memref<1x1x256xf32, #tpu.memory_space<vmem>>, vector<1x1x256xf32>,
    return
  }
  func.func @transform_0(%arg0: i32, %arg1: i32) -> i32 {
    %c0_i32 = arith.constant 0 : i32
    %c0_i32_0 = arith.constant 0 : i32
    return %c0_i32 : i32
  }
  func.func @transform_1(%arg0: i32, %arg1: i32) -> (i32, i32) {
    %c0_i32 = arith.constant 0 : i32
    %c0_i32_0 = arith.constant 0 : i32
    %c0_i32_1 = arith.constant 0 : i32
    return %c0_i32, %c0_i32_0 : i32, i32
  }
  func.func @transform_2(%arg0: i32, %arg1: i32) -> (i32, i32, i32) {
    %c0_i32 = arith.constant 0 : i32
    %c0_i32_0 = arith.constant 0 : i32
    return %arg0, %c0_i32, %arg1 : i32, i32, i32
  }
  func.func @transform_3(%arg0: i32, %arg1: i32) -> (i32, i32, i32) {
    %c0_i32 = arith.constant 0 : i32
    %c0_i32_0 = arith.constant 0 : i32
    return %arg0, %c0_i32, %arg1 : i32, i32, i32
  }
}

</mosaic_0001>

<bundles_post_ra>
// kernel: tpu_custom_call.1
= control target key start
LH: loop header
LB: loop body
LE: loop exit
PB: predicated region body
PF: predicated region fallthrough
CT: control target
= control target key end

     0   :  { %s785_s0 = inlined_call_operand.<no memory space> [shape: f32[1], index: 0, kind: input, shape index: {}]   ;;  %s786_s1 = inlined_call_operand.vmem [shape: f32[1,64], index: 1, kind: input, shape index: {}]   ;;  %s787_s2 = inlined_call_operand.hbm [shape: f32[2,64,256], index: 2, kind: input, shape index: {}]   ;;  %s788_s3 = inlined_call_operand.hbm [shape: f32[2,1,256], index: 3, kind: output, shape index: {}]  }
   0x1   :  { %8 = sst [smem:[#allocation2]] %s785_s0 }
   0x2   :  { %9 = vsyncpa [#allocation4], 0 }
   0x3   :  { %11 = vsyncpa [#allocation4 + $0x1], 0 }
   0x4   :  { %12 = vsyncpa [#allocation5], 0 }
   0x5   :  { %14 = vsyncpa [#allocation5 + $0x1], 0  ;;  %s655_s14 = smov 0   ;;  %s657_s15 = smov 0  }
   0x6   :  { %s659_s16 = smov 0   ;;  %s661_s17 = smov 0  }
   0x7   :  { %s663_s18 = smov 0   ;;  %s665_s19 = smov 0  }
   0x8 LB: > { %s425_s0 = sadd.s32 4294967295, %s628_s19   ;;  %s426_s20 = sadd.s32 4294967294, %s628_s19   ;;  %s628_s19 = sphi %s665_s19, %s20_s19   ;;  %s624_s18 = sphi %s663_s18, %s799_s18   ;;  %s620_s17 = sphi %s661_s17, %s798_s17   ;;  %s616_s16 = sphi %s659_s16, %s797_s16   ;;  %s612_s15 = sphi %s657_s15, %s796_s15   ;;  %s608_s14 = sphi %s655_s14, %s795_s14  }
   0x9   : > { %s32_s21 = sadd.s32 1, %s624_s18  ;;  %s83_s22 = sadd.s32 1, %s616_s16 }
   0xa   : > { %p34_p0 = scmp.ge.s32.totalorder %s32_s21, 2  ;;  %p90_p1 = scmp.ne.s32.totalorder %s616_s16, %s612_s15 }
   0xb   : > { %p91_p2 = scmp.eq.s32.totalorder %s628_s19, 0  ;;  %p96_p3 = scmp.ne.s32.totalorder %s612_s15, %s608_s14 }
   0xc   : > { %s801_s21 = smov (%p34_p0, %s32_s21), 0  ;;  %p97_p5 = scmp.eq.s32.totalorder %s425_s0, 0 }
   0xd   : > { %p696_p4 = por %p91_p2, %p90_p1  ;;  %s78_s24 = ssub.s32 %s624_s18, %s801_s21 }
   0xe   : > { %p122_p6 = scmp.eq.s32.totalorder %s425_s0, 1  ;;  %p81_p7 = scmp.eq.s32.totalorder %s78_s24, 0 }
   0xf   : > { %p702_p8 = por %p97_p5, %p96_p3  ;;  %p128_p10 = scmp.eq.s32.totalorder %s426_s20, 1 }
  0x10   : > { %p706_p9 = por %p122_p6, %p90_p1  ;;  %p428_p12 = scmp.ge.s32.totalorder %s628_s19, 2 }
  0x11   : > { %s711_s27 = scalar_select %p81_p7, %s616_s16, %s83_s22  }
  0x12   : > { %p713_p11 = por %p128_p10, %p96_p3  ;;  %p456_p13 = scmp.lt.s32.totalorder %s628_s19, 2 }
  0x13   : > { %s154_s29 = sand.u32 1, %s616_s16   ;;  %s443_s4 = sshll.u32 %s624_s18, 7 }
  0x14   : > { %s429_s30 = sshll.u32 %s154_s29, 7  ;;  %s165_s7 = scalar_lea.hbm %s787_s2, %s443_s4 }
  0x15   : > { %s158_s8 = scalar_lea.vmem [#allocation3], %s429_s30  ;;  %s166_s10 = sshll.u32 %s165_s7, 4  ;;  %s167_s10 = int_to_ptr.hbm [resolvable:$true] %s166_s10 }
  0x16   : > { %s168_s9 = sshll.u32 %s158_s8, 4  ;;  %p449_p0 = pnand %p456_p13, %p696_p4  ;;  %s169_s9 = int_to_ptr.vmem [resolvable:$true] %s168_s9 }
  0x17   : > { %p432_p1 = scmp.ge.s32.totalorder %s628_s19, 1  ;;  %s155_s11 = scalar_lea.sflag [#allocation4], %s154_s29 }
  0x18   : > { %s630_s12 = smov 256   ;;  %s631_s13 = smov 16  }
  0x19   : > { %451 = dma.hbm_to_vmem [thread:$0]  (!%p449_p0), %s167_s10, 2048, %s169_s9, %s155_s11, %s630_s12, %s630_s12, %s631_s13  }
  0x1a   : > { %p176_p2 = scmp.lt.s32.totalorder %s628_s19, 3 }
  0x1c   : > { %p177_p3 = pnand %p432_p1, %p176_p2 }
  0x1d   : > { %s729_s0 = sand.u32 (!%p177_p3), 1, %s612_s15  }
  0x1e   : > { %180 = sbr.rel (%p177_p3) target bundleno = 215 (0xd7), region = 32  ;;  %s433_s20 = sshll.u32 (!%p177_p3), %s729_s0, 7 }
  0x1f   : > { %s183_s22 = scalar_lea.sflag (!%p177_p3), [#allocation4], %s729_s0  ;;  %s186_s24 = scalar_lea.vmem (!%p177_p3), [#allocation3], %s433_s20 }
  0x23   : > { %599 = dma.done.wait (%p702_p8), %s183_s22, 2048  }
  0x24   : > { %601 = vsyncadd (%p702_p8), %s183_s22, 4294965248  ;;  %v227_v0 = vld [vmem:[%s186_s24 + $0x70] sm:$0xff]  ;;  %v228_v1 = vld [vmem:[%s186_s24 + $0x78] sm:$0xff]  ;;  %vm231_vm0 = vcmask 523264   ;;  %s229_s29 = sld [smem:[#allocation2]]  ;;  %s434_s30 = sshll.u32 %s729_s0, 1  ;;  %v319_v43 = vlaneseq }
  0x25   : > { %v225_v2 = vld [vmem:[%s186_s24 + $0x60] sm:$0xff]  ;;  %243 = vmatpush.msra.mxu0 %v227_v0  ;;  %263 = vmatpush.msra.mxu1 %v228_v1  ;;  %v226_v3 = vld [vmem:[%s186_s24 + $0x68] sm:$0xff]  ;;  %v223_v4 = vld [vmem:[%s186_s24 + $0x50] sm:$0xff]  ;;  %s440_s4 = sshll.u32 %s620_s17, 1  ;;  %s209_s17 = scalar_lea.vmem [#allocation6], %s434_s30  ;;  %vm316_vm8 = vcmask 1040384  }
  0x26   : > { %v224_v5 = vld [vmem:[%s186_s24 + $0x58] sm:$0xff]  ;;  %v221_v6 = vld [vmem:[%s186_s24 + $0x40] sm:$0xff]  ;;  %v222_v7 = vld [vmem:[%s186_s24 + $0x48] sm:$0xff]  ;;  %s337_s7 = scalar_lea.hbm %s788_s3, %s440_s4  ;;  %s339_s8 = sshll.u32 %s209_s17, 4  ;;  %vm321_vm10 = vcmp.lt.s32.totalorder %v319_v43, 256  ;;  %s340_s8 = int_to_ptr.vmem [resolvable:$true] %s339_s8 }
  0x27   : > { %244 = vmatpush.msra.mxu0 %v225_v2  ;;  %264 = vmatpush.msra.mxu1 %v226_v3  ;;  %v219_v8 = vld [vmem:[%s186_s24 + $0x30] sm:$0xff]  ;;  %v220_v9 = vld [vmem:[%s186_s24 + $0x38] sm:$0xff]  ;;  %v217_v10 = vld [vmem:[%s186_s24 + $0x20] sm:$0xff]  ;;  %s341_s9 = sshll.u32 %s337_s7, 4  ;;  %s325_s10 = scalar_lea.sflag [#allocation5], %s729_s0  ;;  %s342_s9 = int_to_ptr.hbm [resolvable:$true] %s341_s9 }
  0x28   : > { %v218_v11 = vld [vmem:[%s186_s24 + $0x28] sm:$0xff]  ;;  %v215_v12 = vld [vmem:[%s186_s24 + $0x10] sm:$0xff]  ;;  %v216_v13 = vld [vmem:[%s186_s24 + $0x18] sm:$0xff]  ;;  %s560_s11 = sshra.s32 %s342_s9, 4  ;;  %s566_s22 = scalar_lea.hbm %s788_s3, 4  ;;  %s561_s11 = int_to_ptr.hbm [resolvable:$true] %s560_s11 }
  0x29   : > { %245 = vmatpush.msra.mxu0 %v223_v4  ;;  %265 = vmatpush.msra.mxu1 %v224_v5  ;;  %v213_v14 = vld [vmem:[%s186_s24] sm:$0xff]  ;;  %v214_v15 = vld [vmem:[%s186_s24 + $0x8] sm:$0xff]  ;;  %s562_s12 = scalar_lea.hbm %s561_s11, 2  ;;  %p567_p7 = scmp.lt.s32.totalorder %s561_s11, %s788_s3 }
  0x2a   : > { %v212_v16 = vld [vmem:[%s786_s1] sm:$0x1]  ;;  %v230_v17 = vstv %s229_s29  ;;  %p563_p4 = scmp.ne.s32.totalorder %s561_s11, %s562_s12  ;;  %p568_p8 = scmp.lt.s32.totalorder %s566_s22, %s562_s12 }
  0x2b   : > { %246 = vmatpush.msra.mxu0 %v221_v6  ;;  %266 = vmatpush.msra.mxu1 %v222_v7 }
  0x2c   : > { %p564_p5 = pnand %p563_p4, %p706_p9  ;;  %p569_p10 = por %p568_p8, %p567_p7 }
  0x2d   : > { %247 = vmatpush.msra.mxu0 %v219_v8  ;;  %267 = vmatpush.msra.mxu1 %v220_v9 }
  0x2e   : > { %p565_p6 = pneg %p564_p5 }
  0x2f   : > { %248 = vmatpush.msra.mxu0 %v217_v10  ;;  %268 = vmatpush.msra.mxu1 %v218_v11 }
  0x30   : > { %p570_p13 = pnand %p569_p10, %p565_p6 }
  0x31   : > { %249 = vmatpush.msra.mxu0 %v215_v12  ;;  %269 = vmatpush.msra.mxu1 %v216_v13 }
  0x33   : > { %250 = vmatpush.msra.mxu0 %v213_v14  ;;  %270 = vmatpush.msra.mxu1 %v214_v15 }
  0x34   : > { %435 = vmatmul.msk.f32.vlgmr.msra.gmra.mxu0 %vm231_vm0, %v212_v16  ;;  %436 = vmatmul.msk.f32.vlgmr.msra.gmra.mxu1 %vm231_vm0, %v212_v16 }
  0xb1   : > { %v252_v18 = vpop.f32.mrf.mxu0  ;;  %v272_v19 = vpop.f32.mrf.mxu1 }
  0xb2   : > { %v253_v20 = vadd.f32 %v252_v18, %v230_v17  ;;  %v273_v21 = vadd.f32 %v272_v19, %v230_v17 }
  0xb4   : > { %v437_v22 = vmul.f32 -1.442695, %v253_v20  ;;  %v438_v23 = vmul.f32 -1.442695, %v273_v21 }
  0xb6   : > { %508 = vpow2.f32 %v437_v22 }
  0xb7   : > { %510 = vpow2.f32 %v438_v23 }
  0xbc   : > { %v509_v24 = vpop.eup %508 }
  0xbd   : > { %v511_v25 = vpop.eup %510  ;;  %v281_v26 = vadd.f32 1.0, %v509_v24 }
  0xbe   : > { %v282_v27 = vadd.f32 1.0, %v511_v25 }
  0xbf   : > { %512 = vrcp.f32 %v281_v26  ;;  %vm288_vm3 = vweird.f32 %v281_v26  ;;  %v294_v38 = vand.u32 2147483648, %v281_v26  ;;  %v292_v42 = vand.u32 2147483647, %v281_v26 }
  0xc0   : > { %514 = vrcp.f32 %v282_v27  ;;  %v309_v35 = vand.u32 2147483648, %v282_v27  ;;  %v307_v37 = vand.u32 2147483647, %v282_v27  ;;  %vm303_vm4 = vweird.f32 %v282_v27 }
  0xc1   : > { %v295_v47 = vor.u32 1.1754944e-38, %v294_v38  ;;  %vm293_vm9 = vcmp.eq.f32.partialorder %v292_v42, 8.507059e+37 }
  0xc2   : > { %v310_v44 = vor.u32 1.1754944e-38, %v309_v35  ;;  %vm308_vm7 = vcmp.eq.f32.partialorder %v307_v37, 8.507059e+37 }
  0xc5   : > { %v513_v28 = vpop.eup %512 }
  0xc6   : > { %v515_v29 = vpop.eup %514  ;;  %v284_v30 = vmul.f32 %v513_v28, %v281_v26  ;;  %vm289_vm1 = vweird.f32 %v513_v28 }
  0xc7   : > { %v299_v31 = vmul.f32 %v515_v29, %v282_v27  ;;  %vm304_vm2 = vweird.f32 %v515_v29  ;;  %vm745_vm5 = vmor %vm288_vm3, %vm289_vm1 }
  0xc8   : > { %v285_v32 = vsub.f32 1.0, %v284_v30  ;;  %vm305_vm6 = vmor %vm303_vm4, %vm304_vm2 }
  0xc9   : > { %v300_v33 = vsub.f32 1.0, %v299_v31 }
  0xca   : > { %v286_v34 = vmul.f32 %v513_v28, %v285_v32 }
  0xcb   : > { %v301_v36 = vmul.f32 %v515_v29, %v300_v33 }
  0xcc   : > { %v287_v39 = vadd.f32 %v513_v28, %v286_v34 }
  0xcd   : > { %v302_v40 = vadd.f32 %v515_v29, %v301_v36 }
  0xce   : > { %v291_v45 = vsel %vm745_vm5, %v513_v28, %v287_v39 }
  0xcf   : > { %v306_v46 = vsel %vm305_vm6, %v515_v29, %v302_v40  ;;  %v296_v50 = vsel %vm293_vm9, %v295_v47, %v291_v45 }
  0xd0   : > { %v311_v48 = vsel %vm308_vm7, %v310_v44, %v306_v46 }
  0xd1   : > { %v315_v49 = vrot.slane %v311_v48, 7 }
  0xd3   : > { %v317_v51 = vsel %vm316_vm8, %v296_v50, %v315_v49 }
  0xd4   : > { %323 = vst.msk [vmem:[%s209_s17] sm:$0x3] %vm321_vm10, %v317_v51 }
  0xd5   : > { %573 = shalt.err (!%p570_p13)
}
  0xd6   : > { %446 = dma.vmem_to_hbm [thread:$0]  (%p706_p9), %s340_s8, 32, %s342_s9, %s325_s10  }
  0xd7 PF: > { %s353_s0 = sand.u32 1, %s608_s14   ;;  %p453_p0 = pnand %p428_p12, %p713_p11 }
  0xd8   : > { %s354_s25 = scalar_lea.sflag [#allocation5], %s353_s0 }
  0xd9   : > { %p454_p1 = pneg %p453_p0 }
  0xdb   : > { %603 = dma.done.wait (%p454_p1), %s354_s25, 32  }
  0xdc   : > { %605 = vsyncadd (%p454_p1), %s354_s25, 4294967264  ;;  %s20_s19 = sadd.s32 1, %s628_s19   ;;  %s795_s14 = smov %s612_s15 }
  0xdd   : > { %p17_p2 = scmp.ge.s32.totalorder %s20_s19, 4   ;;  %s796_s15 = smov %s616_s16 }
  0xde   : > { %s797_s16 = smov %s711_s27  ;;  %s798_s17 = smov %s624_s18 }
  0xdf   : > { %s799_s18 = smov %s801_s21  ;;  %19 = sbr.rel (!%p17_p2) target bundleno = 8 (0x8), region = 77 }
  0xe4   :  { %360 = vsyncpa [#allocation4], 1 }
  0xe5   :  { %362 = vsyncpa [#allocation4 + $0x1], 1 }
  0xe6   :  { %363 = vsyncpa [#allocation5], 1 }
  0xe7   :  { %365 = vsyncpa [#allocation5 + $0x1], 1 }

</bundles_post_ra>
